<compile_context>
chip_gen: v7x
topology: tpu7x:2x2x1
jax: 0.10.0
libtpu: 0.0.40
codegen_flags: <defaults>
</compile_context>

<pallas_src>
import jax
import jax.numpy as jnp
from jax import lax
from jax.experimental import pallas as pl
from jax.experimental.pallas import tpu as pltpu

_LANE = 128
_SUBLANE = 8


def _round_up(v, m):
    return ((v + m - 1) // m) * m


# --- GradientReverseLayer: identity forward, sign-flipped gradient ----------
@jax.custom_vjp
def _grad_reverse(x):
    return x


def _grad_reverse_fwd(x):
    return x, None


def _grad_reverse_bwd(_, g):
    return (-g,)


_grad_reverse.defvjp(_grad_reverse_fwd, _grad_reverse_bwd)


# --- Pallas kernel ----------------------------------------------------------
def _res_classifier_kernel(x_ref, w_ref, b_ref, o_ref):
    # x_ref: (TILE_B, U)  w_ref: (C_pad, U)  b_ref: (1, C_pad)  o_ref: (TILE_B, C_pad)
    # Contract last dim of x with last dim of w directly (Linear's x @ W.T),
    # letting Mosaic feed the MXU in transposed-RHS form (no explicit .T).
    acc = lax.dot_general(
        x_ref[...], w_ref[...],
        dimension_numbers=(((1,), (1,)), ((), ())),
        preferred_element_type=jnp.float32)
    o_ref[...] = (acc + b_ref[...].astype(jnp.float32)).astype(o_ref.dtype)


def res_classifier_forward(x, weight, bias, reverse=False, tile_b=512):
    """Forward pass of ResClassifier.

    Args:
      x:       (batch, unit_size)
      weight:  (num_classes, unit_size)   (PyTorch nn.Linear layout)
      bias:    (num_classes,)
      reverse: if True, apply gradient-reversal (identity forward, -grad bwd).
      tile_b:  max batch tile size (rounded to a multiple of 8 sublanes).
    Returns:
      (batch, num_classes) with x.dtype.
    """
    if reverse:
        x = _grad_reverse(x)
    # TODO(synk): training through the linear itself would need a custom VJP
    # around pallas_call; only the GRL sign-flip on x is wired for autodiff.

    b, u = x.shape
    c, u2 = weight.shape
    assert u == u2, "unit_size mismatch between x and weight"

    # Lane-dense output: pad num_classes up to a multiple of 128.
    c_pad = _round_up(c, _LANE)
    # Batch tiling: tile must be a multiple of 8 sublanes; pad batch to tiles.
    b_pad = _round_up(b, _SUBLANE)
    tile = min(_round_up(tile_b, _SUBLANE), b_pad)
    b_pad = _round_up(b_pad, tile)

    x_p = x if b_pad == b else jnp.pad(x, ((0, b_pad - b), (0, 0)))
    w_p = weight if c_pad == c else jnp.pad(weight, ((0, c_pad - c), (0, 0)))
    bias_p = bias if c_pad == c else jnp.pad(bias, (0, c_pad - c))
    bias2d = bias_p.reshape(1, c_pad)

    grid = (b_pad // tile,)

    itemsize = jnp.dtype(x.dtype).itemsize
    cost = pl.CostEstimate(
        flops=2 * b_pad * u * c_pad,
        transcendentals=0,
        bytes_accessed=(b_pad * u + c_pad * u + c_pad + b_pad * c_pad) * itemsize,
    )

    out_p = pl.pallas_call(
        _res_classifier_kernel,
        out_shape=jax.ShapeDtypeStruct((b_pad, c_pad), x.dtype),
        grid_spec=pl.GridSpec(
            grid=grid,
            in_specs=[
                pl.BlockSpec((tile, u), lambda i: (i, 0)),      # x: tiled over batch
                pl.BlockSpec((c_pad, u), lambda i: (0, 0)),     # weight: resident
                pl.BlockSpec((1, c_pad), lambda i: (0, 0)),     # bias: resident
            ],
            out_specs=pl.BlockSpec((tile, c_pad), lambda i: (i, 0)),
        ),
        compiler_params=pltpu.CompilerParams(
            dimension_semantics=("parallel",),
            vmem_limit_bytes=64 * 1024 * 1024,
        ),
        cost_estimate=cost,
    )(x_p, w_p, bias2d)

    return out_p[:b, :c]


if __name__ == "__main__":
    # Small shapes consistent with the module: unit_size=32, num_classes=10.
    batch = 8
    unit_size = 32
    num_classes = 10

    key = jax.random.PRNGKey(0)
    kx, kw, kb = jax.random.split(key, 3)

    x = jax.random.normal(kx, (batch, unit_size), dtype=jnp.float32)
    # Deterministic parameter init (mimicking nn.Linear's uniform init range).
    bound = 1.0 / (unit_size ** 0.5)
    weight = jax.random.uniform(kw, (num_classes, unit_size),
                                minval=-bound, maxval=bound, dtype=jnp.float32)
    bias = jax.random.uniform(kb, (num_classes,),
                              minval=-bound, maxval=bound, dtype=jnp.float32)

    out = res_classifier_forward(x, weight, bias, reverse=False)
    out = jax.block_until_ready(out)

    # Reference check against plain JAX.
    ref = x @ weight.T + bias
    assert out.shape == (batch, num_classes)
    assert jnp.allclose(out, ref, atol=1e-5, rtol=1e-5), "mismatch vs reference"

    # Also exercise the reverse=True path (forward must be identical).
    out_rev = jax.block_until_ready(
        res_classifier_forward(x, weight, bias, reverse=True))
    assert jnp.allclose(out_rev, ref, atol=1e-5, rtol=1e-5), "reverse path mismatch"

    print("KERNEL_OK")
</pallas_src>

<mosaic_0001>
module attributes {stable_mosaic.version = 11 : i64} {
  func.func @_res_classifier_kernel(%arg0: i32, %arg1: memref<8x32xf32, #tpu.memory_space<vmem>>, %arg2: memref<128x32xf32, #tpu.memory_space<vmem>>, %arg3: memref<1x128xf32, #tpu.memory_space<vmem>>, %arg4: memref<8x128xf32, #tpu.memory_space<vmem>>) attributes {dimension_semantics = [#tpu.dimension_semantics<parallel>], iteration_bounds = array<i64: 1>, scalar_prefetch = 0 : i64, scratch_operands = 0 : i64, tpu.core_type = #tpu.core_type<tc>, window_params = [{transform_indices = @transform_0, window_bounds = array<i64: 8, 32>}, {pipeline_mode = #tpu.pipeline_mode<synchronous>, transform_indices = @transform_1, window_bounds = array<i64: 128, 32>}, {pipeline_mode = #tpu.pipeline_mode<synchronous>, transform_indices = @transform_2, window_bounds = array<i64: 1, 128>}, {transform_indices = @transform_3, window_bounds = array<i64: 8, 128>}]} {
    %c0 = arith.constant 0 : index
    %c0_0 = arith.constant 0 : index
    %0 = vector.load %arg1[%c0, %c0_0] : memref<8x32xf32, #tpu.memory_space<vmem>>, vector<8x32xf32>
    %c0_1 = arith.constant 0 : index
    %c0_2 = arith.constant 0 : index
    %1 = vector.load %arg2[%c0_1, %c0_2] : memref<128x32xf32, #tpu.memory_space<vmem>>, vector<128x32xf32>
    %cst = arith.constant dense<0.000000e+00> : vector<8x128xf32>
    %2 = tpu.matmul %0, %1, %cst {dimension_numbers = #tpu.dot_dimension_numbers<[1], [1], [0], [0], [0, 0, 1, 0], [], []>} : vector<8x32xf32>, vector<128x32xf32>, vector<8x128xf32> -> vector<8x128xf32>
    %c0_3 = arith.constant 0 : index
    %c0_4 = arith.constant 0 : index
    %3 = vector.load %arg3[%c0_3, %c0_4] : memref<1x128xf32, #tpu.memory_space<vmem>>, vector<1x128xf32>
    %4 = vector.broadcast %3 : vector<1x128xf32> to vector<8x128xf32>
    %5 = arith.addf %2, %4 : vector<8x128xf32>
    %c0_5 = arith.constant 0 : index
    %c0_6 = arith.constant 0 : index
    %6 = vector.load %arg4[%c0_5, %c0_6] : memref<8x128xf32, #tpu.memory_space<vmem>>, vector<8x128xf32>
    tpu.vector_store %arg4[%c0_5, %c0_6], %5 {strides = array<i32>} : memref<8x128xf32, #tpu.memory_space<vmem>>, vector<8x128xf32>,
    return
  }
  func.func @transform_0(%arg0: i32) -> (i32, i32) {
    %c0_i32 = arith.constant 0 : i32
    %c0_i32_0 = arith.constant 0 : i32
    return %arg0, %c0_i32 : i32, i32
  }
  func.func @transform_1(%arg0: i32) -> (i32, i32) {
    %c0_i32 = arith.constant 0 : i32
    %c0_i32_0 = arith.constant 0 : i32
    %c0_i32_1 = arith.constant 0 : i32
    return %c0_i32, %c0_i32_0 : i32, i32
  }
  func.func @transform_2(%arg0: i32) -> (i32, i32) {
    %c0_i32 = arith.constant 0 : i32
    %c0_i32_0 = arith.constant 0 : i32
    %c0_i32_1 = arith.constant 0 : i32
    return %c0_i32, %c0_i32_0 : i32, i32
  }
  func.func @transform_3(%arg0: i32) -> (i32, i32) {
    %c0_i32 = arith.constant 0 : i32
    %c0_i32_0 = arith.constant 0 : i32
    return %arg0, %c0_i32 : i32, i32
  }
}

</mosaic_0001>

<bundles_post_ra>
// kernel: tpu_custom_call.1
= control target key start
LH: loop header
LB: loop body
LE: loop exit
PB: predicated region body
PF: predicated region fallthrough
CT: control target
= control target key end

     0   :  { %8 = vsyncpa [#allocation3], 0  ;;  %s520_s0 = inlined_call_operand.hbm [shape: f32[8,32], index: 0, kind: input, shape index: {}]   ;;  %s521_s1 = inlined_call_operand.hbm [shape: f32[128,32], index: 1, kind: input, shape index: {}]   ;;  %s522_s2 = inlined_call_operand.hbm [shape: f32[1,128], index: 2, kind: input, shape index: {}]   ;;  %s523_s3 = inlined_call_operand.hbm [shape: f32[8,128], index: 3, kind: output, shape index: {}]  }
   0x1   :  { %9 = vsyncpa [#allocation6], 0 }
   0x2   :  { %10 = vsyncpa [#allocation4], 0  ;;  %s420_s12 = smov [#allocation5]   ;;  %s326_s16 = scalar_lea.hbm %s521_s1, 2048 }
   0x3   :  { %s26_s13 = sshll.u32 %s420_s12, 4  ;;  %p327_p0 = scmp.ne.s32.totalorder %s521_s1, %s326_s16  ;;  %s27_s13 = int_to_ptr.vmem [resolvable:$true] %s26_s13 }
   0x4   :  { %p330_p1 = scmp.lt.u32.totalorder %s326_s16, %s521_s1 }
   0x6   :  { %p332_p2 = pnand %p330_p1, %p327_p0 }
   0x8   :  { %335 = shalt.err (!%p332_p2)
}
   0x9   :  { %s336_s21 = scalar_lea.vmem %s27_s13, 2048  ;;  %p341_p4 = scmp.lt.s32.totalorder %s27_s13, %s27_s13 }
   0xa   :  { %p337_p3 = scmp.ne.s32.totalorder %s27_s13, %s336_s21  ;;  %p342_p5 = scmp.lt.s32.totalorder %s336_s21, %s336_s21 }
   0xc   :  { %p343_p6 = por %p342_p5, %p341_p4 }
   0xe   :  { %p344_p7 = pnand %p343_p6, %p337_p3 }
  0x10   :  { %347 = shalt.err (!%p344_p7)
}
  0x11   :  { %s421_s22 = smov 128   ;;  %s422_s23 = smov 8  }
  0x12   :  { %32 = dma.hbm_to_vmem [thread:$0]  %s521_s1, 2048, %s27_s13, [#allocation6], %s421_s22, %s421_s22, %s422_s23  }
  0x13   :  { %s423_s26 = smov [#allocation2]   ;;  %s424_s28 = smov [#allocation7]  }
  0x14   :  { %s17_s27 = sshll.u32 %s423_s26, 4  ;;  %s39_s29 = sshll.u32 %s424_s28, 4  ;;  %s18_s27 = int_to_ptr.vmem [resolvable:$true] %s17_s27  ;;  %s40_s29 = int_to_ptr.vmem [resolvable:$true] %s39_s29 }
  0x15   :  { %s348_s5 = scalar_lea.hbm %s520_s0, 128 }
  0x16   :  { %p349_p8 = scmp.ne.s32.totalorder %s520_s0, %s348_s5  ;;  %p352_p9 = scmp.lt.u32.totalorder %s348_s5, %s520_s0 }
  0x18   :  { %p354_p10 = pnand %p352_p9, %p349_p8 }
  0x1a   :  { %357 = shalt.err (!%p354_p10)
}
  0x1b   :  { %s358_s1 = scalar_lea.vmem %s18_s27, 128  ;;  %p363_p12 = scmp.lt.s32.totalorder %s18_s27, %s18_s27 }
  0x1c   :  { %p359_p11 = scmp.ne.s32.totalorder %s18_s27, %s358_s1  ;;  %p364_p13 = scmp.lt.s32.totalorder %s358_s1, %s358_s1 }
  0x1e   :  { %p365_p0 = por %p364_p13, %p363_p12 }
  0x20   :  { %p366_p1 = pnand %p365_p0, %p359_p11 }
  0x22   :  { %369 = shalt.err (!%p366_p1)
}
  0x23   :  { %20 = dma.hbm_to_vmem [thread:$0]  %s520_s0, 128, %s18_s27, [#allocation3]  }
  0x24   :  { %s370_s14 = scalar_lea.hbm %s522_s2, 16 }
  0x25   :  { %p371_p2 = scmp.ne.s32.totalorder %s522_s2, %s370_s14  ;;  %p374_p3 = scmp.lt.u32.totalorder %s370_s14, %s522_s2 }
  0x27   :  { %p376_p4 = pnand %p374_p3, %p371_p2 }
  0x29   :  { %379 = shalt.err (!%p376_p4)
}
  0x2a   :  { %s380_s19 = scalar_lea.vmem %s40_s29, 16  ;;  %s384_s20 = scalar_lea.vmem %s40_s29, 32 }
  0x2b   :  { %p381_p5 = scmp.ne.s32.totalorder %s40_s29, %s380_s19  ;;  %p385_p6 = scmp.lt.s32.totalorder %s40_s29, %s40_s29 }
  0x2c   :  { %p386_p7 = scmp.lt.s32.totalorder %s384_s20, %s380_s19 }
  0x2e   :  { %p387_p8 = por %p386_p7, %p385_p6 }
  0x30   :  { %p388_p9 = pnand %p387_p8, %p381_p5 }
  0x32   :  { %391 = shalt.err (!%p388_p9)
}
  0x33   :  { %42 = dma.hbm_to_vmem [thread:$0]  %s522_s2, 16, %s40_s29, [#allocation6]  }
  0x34   :  { %414 = dma.done.wait [#allocation3], 128  }
  0x35   :  { %415 = vsyncadd [#allocation3], 4294967168 }
  0x36   :  { %416 = dma.done.wait [#allocation6], 2064  }
  0x37   :  { %417 = vsyncadd [#allocation6], 4294965232  ;;  %v425_v0 = vmov 0.0|0.0   ;;  %vm426_vm0 = vmmov 0   ;;  %v427_v1 = vmov 0.0   ;;  %vm76_vm1 = vcmask 261120  }
  0x38   :  { %285 = vmatprep.subr.bf16.mxu0 %v425_v0  ;;  %282 = vmatprep.mubr.msk.f32.mxu0 %vm426_vm0, %v427_v1  ;;  %v53_v2 = vld [vmem:[#allocation5] sm:$0xff]  ;;  %v54_v3 = vld [vmem:[#allocation5 + $0x8] sm:$0xff]  ;;  %vm487_vm2 = vmpackc.low %vm76_vm1, %vm76_vm1  ;;  %s428_s2 = smov [#allocation8]  }
  0x39   :  { %v286_v5 = vpack.c.bf16 %v54_v3, %v53_v2  ;;  %v55_v6 = vld [vmem:[#allocation5 + $0x10] sm:$0xff]  ;;  %v56_v7 = vld [vmem:[#allocation5 + $0x18] sm:$0xff]  ;;  %v57_v9 = vld [vmem:[#allocation5 + $0x20] sm:$0xff]  ;;  %s205_s22 = sshll.u32 %s428_s2, 4  ;;  %s206_s22 = int_to_ptr.vmem [resolvable:$true] %s205_s22 }
  0x3a   :  { %v290_v8 = vpack.c.bf16 %v56_v7, %v55_v6  ;;  %v58_v10 = vld [vmem:[#allocation5 + $0x28] sm:$0xff]  ;;  %v59_v12 = vld [vmem:[#allocation5 + $0x30] sm:$0xff]  ;;  %v60_v13 = vld [vmem:[#allocation5 + $0x38] sm:$0xff]  ;;  %s392_s23 = scalar_lea.vmem %s206_s22, 128  ;;  %p397_p11 = scmp.lt.s32.totalorder %s206_s22, %s206_s22 }
  0x3b   :  { %288 = vmatpush3.bf16.xpose.msk.msra.mxu0 %vm487_vm2, %v286_v5  ;;  %v294_v11 = vpack.c.bf16 %v58_v10, %v57_v9  ;;  %v298_v14 = vpack.c.bf16 %v60_v13, %v59_v12  ;;  %v61_v15 = vld [vmem:[#allocation5 + $0x40] sm:$0xff]  ;;  %v62_v16 = vld [vmem:[#allocation5 + $0x48] sm:$0xff]  ;;  %v63_v18 = vld [vmem:[#allocation5 + $0x50] sm:$0xff]  ;;  %p393_p10 = scmp.ne.s32.totalorder %s206_s22, %s392_s23  ;;  %p398_p12 = scmp.lt.s32.totalorder %s392_s23, %s392_s23 }
  0x3c   :  { %289 = vmatprep.subr.bf16.mxu0 %v425_v0  ;;  %v302_v17 = vpack.c.bf16 %v62_v16, %v61_v15  ;;  %v64_v19 = vld [vmem:[#allocation5 + $0x58] sm:$0xff]  ;;  %v65_v21 = vld [vmem:[#allocation5 + $0x60] sm:$0xff]  ;;  %v66_v22 = vld [vmem:[#allocation5 + $0x68] sm:$0xff] }
  0x3d   :  { %v306_v20 = vpack.c.bf16 %v64_v19, %v63_v18  ;;  %v310_v23 = vpack.c.bf16 %v66_v22, %v65_v21  ;;  %v67_v24 = vld [vmem:[#allocation5 + $0x70] sm:$0xff]  ;;  %v68_v25 = vld [vmem:[#allocation5 + $0x78] sm:$0xff]  ;;  %v215_v28 = vld [vmem:[#allocation7] ss:$0 sm:$0xff]  ;;  %p399_p13 = por %p398_p12, %p397_p11 }
  0x3e   :  { %v314_v26 = vpack.c.bf16 %v68_v25, %v67_v24  ;;  %v52_v27 = vld [vmem:[#allocation2] sm:$0xff] }
  0x3f   :  { %p400_p0 = pnand %p399_p13, %p393_p10 }
  0x43   :  { %292 = vmatpush3.bf16.xpose.msk.msra.mxu0 %vm487_vm2, %v290_v8 }
  0x44   :  { %293 = vmatprep.subr.bf16.mxu0 %v425_v0 }
  0x4b   :  { %296 = vmatpush3.bf16.xpose.msk.msra.mxu0 %vm487_vm2, %v294_v11 }
  0x4c   :  { %297 = vmatprep.subr.bf16.mxu0 %v425_v0 }
  0x53   :  { %300 = vmatpush3.bf16.xpose.msk.msra.mxu0 %vm487_vm2, %v298_v14 }
  0x54   :  { %301 = vmatprep.subr.bf16.mxu0 %v425_v0 }
  0x5b   :  { %304 = vmatpush3.bf16.xpose.msk.msra.mxu0 %vm487_vm2, %v302_v17 }
  0x5c   :  { %305 = vmatprep.subr.bf16.mxu0 %v425_v0 }
  0x63   :  { %308 = vmatpush3.bf16.xpose.msk.msra.mxu0 %vm487_vm2, %v306_v20 }
  0x64   :  { %309 = vmatprep.subr.bf16.mxu0 %v425_v0 }
  0x6b   :  { %312 = vmatpush3.bf16.xpose.msk.msra.mxu0 %vm487_vm2, %v310_v23 }
  0x6c   :  { %313 = vmatprep.subr.bf16.mxu0 %v425_v0 }
  0x73   :  { %316 = vmatpush3.bf16.xpose.msk.msra.mxu0 %vm487_vm2, %v314_v26 }
  0x7a   :  { %283 = vmatmul.mubr.msk.f32.vlgmr.msra.gmra.mrb[0].mxu0 %vm76_vm1, %v52_v27 }
 0x14d   :  { %v194_v29 = vpop.f32.mrb[0].mxu0 }
 0x14e   :  { %v195_v30 = vadd.f32 %v215_v28, %v194_v29  ;;  %v284_v31 = vpop.f32.mrb[1].mxu0 }
 0x150   :  { %198 = vst [vmem:[#allocation8] sm:$0xff] %v195_v30 }
 0x151   :  { %403 = shalt.err (!%p400_p0)
}
 0x152   :  { %s404_s26 = scalar_lea.hbm %s523_s3, 128 }
 0x153   :  { %p405_p1 = scmp.ne.s32.totalorder %s523_s3, %s404_s26  ;;  %p408_p2 = scmp.lt.u32.totalorder %s404_s26, %s523_s3 }
 0x155   :  { %p410_p3 = pnand %p408_p2, %p405_p1 }
 0x157   :  { %413 = shalt.err (!%p410_p3)
}
 0x158   :  { %208 = dma.vmem_to_hbm [thread:$0]  %s206_s22, 128, %s523_s3, [#allocation4]  }
 0x159   :  { %418 = dma.done.wait [#allocation4], 128  }
 0x15a   :  { %419 = vsyncadd [#allocation4], 4294967168 }
 0x15b   :  { %212 = vsyncpa [#allocation3], 1 }
 0x15c   :  { %213 = vsyncpa [#allocation6], 1 }
 0x15d   :  { %214 = vsyncpa [#allocation4], 1 }

</bundles_post_ra>
